<compile_context>
chip_gen: v7x
topology: tpu7x:2x2x1
jax: 0.10.0
libtpu: 0.0.40
codegen_flags: <defaults>
</compile_context>

<pallas_src>
import jax
import jax.numpy as jnp
from jax import lax
from jax.experimental import pallas as pl
from jax.experimental.pallas import tpu as pltpu


def _round_up(x, m):
    return ((x + m - 1) // m) * m


# ---------------------------------------------------------------------------
# Packed-parameter layout (everything not listed is zero):
#   wbig  (2, 128, 128) bf16 : [0][0:64, :]   = W2 (64 -> 128)
#                              [1][:, 0:64]   = W3 (128 -> 64)
#   small (3,   8, 128) f32  : [0][0, 0:64]   = b1 ; [0][1, :] = b2 ; [0][2, 0:64] = b3
#                              [1][0:4, 0:64] = W1 (4 -> 64)
#                              [2][0:3, 0:64] = fused head weights [pi0; pi1; value] x hidden
#                              [2][0:3, 64]   = fused head biases (col-64 fold)
# ---------------------------------------------------------------------------


def _mlp_kernel(obs_ref, wbig_ref, small_ref, out_ref):
    """One batch tile: obs (TB, 8) -> transposed head outputs (8, TB)."""
    f32, bf16 = jnp.float32, jnp.bfloat16

    x = obs_ref[...]                        # (TB, 8)   bf16: [obs(4) | 0 0 0 0]
    w2 = wbig_ref[0]                        # (128,128) bf16
    w3 = wbig_ref[1]                        # (128,128) bf16
    biases = small_ref[0]                   # (8, 128)  f32: rows 0,1,2 = b1,b2,b3
    w1 = small_ref[1].astype(bf16)          # (8, 128)
    wh = small_ref[2].astype(bf16)          # (8, 128)  heads x hidden (+ bias @ col 64)
    b1 = biases[0:1, :]
    b2 = biases[1:2, :]
    b3 = biases[2:3, :]

    h = jnp.maximum(jnp.dot(x, w1, preferred_element_type=f32) + b1, 0.0)
    h = jnp.maximum(jnp.dot(h.astype(bf16), w2, preferred_element_type=f32) + b2, 0.0)
    h = jnp.maximum(jnp.dot(h.astype(bf16), w3, preferred_element_type=f32) + b3, 0.0)
    # (TB, 128) f32; cols 64..127 are exactly zero (W3 / b3 zero-padded there).

    # Head-bias fold: hidden column 64 is provably zero, set it to 1 so the
    # head matmul picks up the bias stored at wh[:, 64] for free on the MXU.
    col = lax.broadcasted_iota(jnp.int32, h.shape, dimension=1)
    h = jnp.where(col == 64, 1.0, h).astype(bf16)

    # Fused, TRANSPOSED policy/value heads: contract the hidden axis of both
    # operands so the MXU supplies the transpose and the output block is a
    # lane-dense (8, TB) slab (rows 0-1 = pi logits, row 2 = value).
    out_ref[...] = lax.dot_general(wh, h, (((1,), (1,)), ((), ())),
                                   preferred_element_type=f32)


def pack_params(params):
    """Pack the 10 Linear tensors into (wbig bf16, small f32) buffers."""
    (w1, b1, w2, b2, w3, b3, wp, bp, wv, bv) = params
    f32 = jnp.float32

    wbig = jnp.zeros((2, 128, 128), f32)
    wbig = wbig.at[0, 0:64, :].set(w2)
    wbig = wbig.at[1, :, 0:64].set(w3)
    wbig = wbig.astype(jnp.bfloat16)

    small = jnp.zeros((3, 8, 128), f32)
    small = small.at[0, 0, 0:64].set(jnp.reshape(b1, (-1,)))
    small = small.at[0, 1, :].set(jnp.reshape(b2, (-1,)))
    small = small.at[0, 2, 0:64].set(jnp.reshape(b3, (-1,)))
    small = small.at[1, 0:4, 0:64].set(w1)
    wh_t = jnp.concatenate([wp, wv], axis=1).T          # (3, 64): heads x hidden
    small = small.at[2, 0:3, 0:64].set(wh_t)
    bh = jnp.concatenate([jnp.reshape(bp, (-1,)), jnp.reshape(bv, (-1,))])
    small = small.at[2, 0:3, 64].set(bh)                 # head-bias fold column
    return wbig, small


def nn_cartpole_forward(obs, packed):
    """Pallas forward pass. Returns (pi_logits [B, 2], value [B])."""
    wbig, small = packed
    B = obs.shape[0]

    # Tile/grid choice: as few grid steps as possible (per-step overhead
    # dominates at CartPole scale), but >= 2 "parallel" steps once B >= 256 so
    # both v7x TensorCores are used.  TB is a multiple of 128 so the (8, TB)
    # output block stays lane-dense (unmasked stores, also best for v5e).
    TB = min(1024, max(128, _round_up(B, 256) // 2))
    Bp = _round_up(B, TB)
    grid = (Bp // TB,)

    # Single fused pad (no zeros + scatter): batch -> Bp, features 4 -> 8, bf16.
    obs_aug = jnp.pad(obs.astype(jnp.bfloat16), ((0, Bp - B), (0, 4)))

    flops = 2 * Bp * (8 * 128 + 128 * 128 + 128 * 128 + 128 * 8)
    bytes_accessed = (obs_aug.size * 2 + wbig.size * 2 + small.size * 4
                      + 8 * Bp * 4)

    out = pl.pallas_call(
        _mlp_kernel,
        out_shape=jax.ShapeDtypeStruct((8, Bp), jnp.float32),
        grid=grid,
        in_specs=[
            pl.BlockSpec((TB, 8), lambda i: (i, 0)),
            pl.BlockSpec((2, 128, 128), lambda i: (0, 0, 0)),  # VMEM-resident
            pl.BlockSpec((3, 8, 128), lambda i: (0, 0, 0)),    # VMEM-resident
        ],
        out_specs=pl.BlockSpec((8, TB), lambda i: (0, i)),
        compiler_params=pltpu.CompilerParams(
            dimension_semantics=("parallel",)),
        cost_estimate=pl.CostEstimate(
            flops=flops, transcendentals=0, bytes_accessed=bytes_accessed),
    )(obs_aug, wbig, small)

    pi_logits = out[0:2, :B].T                 # (B, 2)
    value = out[2, :B]                         # (B,)
    # TODO(synk): torch.distributions.Categorical has no Pallas equivalent; we
    # return its logits parameterization (sample/log_prob in plain JAX outside).
    return pi_logits, value


def init_params(key):
    """PyTorch nn.Linear-style init U(-1/sqrt(fan_in), 1/sqrt(fan_in)).
    Weights stored transposed: (in_features, out_features)."""
    dims = [(4, 64), (64, 128), (128, 64), (64, 2), (64, 1)]
    params = []
    for fan_in, fan_out in dims:
        key, kw, kb = jax.random.split(key, 3)
        bound = 1.0 / jnp.sqrt(jnp.float32(fan_in))
        w = jax.random.uniform(kw, (fan_in, fan_out), jnp.float32, -bound, bound)
        b = jax.random.uniform(kb, (1, fan_out), jnp.float32, -bound, bound)
        params.extend([w, b])
    return tuple(params)


def reference_forward(obs, params, dtype=jnp.float32):
    """Pure-JAX reference. dtype=bf16 mimics the kernel's bf16-in / f32-acc math."""
    (w1, b1, w2, b2, w3, b3, wp, bp, wv, bv) = params
    f32 = jnp.float32

    def lin(x, w, b):
        return (jnp.dot(x.astype(dtype), w.astype(dtype),
                        preferred_element_type=f32) + b.astype(f32))

    h = jnp.maximum(lin(obs, w1, b1), 0.0)
    h = jnp.maximum(lin(h, w2, b2), 0.0)
    h = jnp.maximum(lin(h, w3, b3), 0.0)
    return lin(h, wp, bp), lin(h, wv, bv).reshape(-1)


if __name__ == "__main__":
    key = jax.random.PRNGKey(0)
    key, kobs = jax.random.split(key)

    # CartPole rollout batch; B=512 -> TB=256, grid=2: both v7x TensorCores
    # busy, a full 256-deep MXU M-pass on v6e, and only 2 cheap steps on v5e.
    B = 512
    obs = jax.random.normal(kobs, (B, 4), jnp.float32)

    params = init_params(key)
    packed = pack_params(params)      # pack once; reuse across forward calls

    fwd = jax.jit(nn_cartpole_forward)
    pi_logits, value = fwd(obs, packed)
    pi_logits = jax.block_until_ready(pi_logits)
    value = jax.block_until_ready(value)

    assert pi_logits.shape == (B, 2)
    assert value.shape == (B,)

    # Tight check vs a reference that mimics the kernel's bf16/f32-acc math.
    ref_pi_b, ref_v_b = reference_forward(obs, params, dtype=jnp.bfloat16)
    assert jnp.allclose(pi_logits, ref_pi_b, atol=5e-3, rtol=5e-3)
    assert jnp.allclose(value, ref_v_b, atol=5e-3, rtol=5e-3)

    # Loose sanity check vs the pure float32 reference (bf16 params/activations).
    ref_pi, ref_v = reference_forward(obs, params, dtype=jnp.float32)
    assert jnp.allclose(pi_logits, ref_pi, atol=5e-2, rtol=5e-2)
    assert jnp.allclose(value, ref_v, atol=5e-2, rtol=5e-2)

    print("KERNEL_OK")
</pallas_src>

<mosaic_0001>
module attributes {stable_mosaic.version = 11 : i64} {
  func.func @_mlp_kernel(%arg0: i32, %arg1: memref<256x8xbf16, #tpu.memory_space<vmem>>, %arg2: memref<2x128x128xbf16, #tpu.memory_space<vmem>>, %arg3: memref<3x8x128xf32, #tpu.memory_space<vmem>>, %arg4: memref<8x256xf32, #tpu.memory_space<vmem>>) attributes {dimension_semantics = [#tpu.dimension_semantics<parallel>], iteration_bounds = array<i64: 2>, scalar_prefetch = 0 : i64, scratch_operands = 0 : i64, tpu.core_type = #tpu.core_type<tc>, window_params = [{transform_indices = @transform_0, window_bounds = array<i64: 256, 8>}, {pipeline_mode = #tpu.pipeline_mode<synchronous>, transform_indices = @transform_1, window_bounds = array<i64: 2, 128, 128>}, {pipeline_mode = #tpu.pipeline_mode<synchronous>, transform_indices = @transform_2, window_bounds = array<i64: 3, 8, 128>}, {transform_indices = @transform_3, window_bounds = array<i64: 8, 256>}]} {
    %c0 = arith.constant 0 : index
    %c0_0 = arith.constant 0 : index
    %0 = vector.load %arg1[%c0, %c0_0] : memref<256x8xbf16, #tpu.memory_space<vmem>>, vector<256x8xbf16>
    %c0_1 = arith.constant 0 : index
    %c0_2 = arith.constant 0 : index
    %c0_3 = arith.constant 0 : index
    %1 = vector.load %arg2[%c0_1, %c0_2, %c0_3] : memref<2x128x128xbf16, #tpu.memory_space<vmem>>, vector<1x128x128xbf16>
    %2 = vector.shape_cast %1 : vector<1x128x128xbf16> to vector<128x128xbf16>
    %c1 = arith.constant 1 : index
    %c0_4 = arith.constant 0 : index
    %c0_5 = arith.constant 0 : index
    %3 = vector.load %arg2[%c1, %c0_4, %c0_5] : memref<2x128x128xbf16, #tpu.memory_space<vmem>>, vector<1x128x128xbf16>
    %4 = vector.shape_cast %3 : vector<1x128x128xbf16> to vector<128x128xbf16>
    %c0_6 = arith.constant 0 : index
    %c0_7 = arith.constant 0 : index
    %c0_8 = arith.constant 0 : index
    %5 = vector.load %arg3[%c0_6, %c0_7, %c0_8] : memref<3x8x128xf32, #tpu.memory_space<vmem>>, vector<1x8x128xf32>
    %6 = vector.shape_cast %5 : vector<1x8x128xf32> to vector<8x128xf32>
    %c1_9 = arith.constant 1 : index
    %c0_10 = arith.constant 0 : index
    %c0_11 = arith.constant 0 : index
    %7 = vector.load %arg3[%c1_9, %c0_10, %c0_11] : memref<3x8x128xf32, #tpu.memory_space<vmem>>, vector<1x8x128xf32>
    %8 = vector.shape_cast %7 : vector<1x8x128xf32> to vector<8x128xf32>
    %9 = arith.truncf %8 : vector<8x128xf32> to vector<8x128xbf16>
    %c2 = arith.constant 2 : index
    %c0_12 = arith.constant 0 : index
    %c0_13 = arith.constant 0 : index
    %10 = vector.load %arg3[%c2, %c0_12, %c0_13] : memref<3x8x128xf32, #tpu.memory_space<vmem>>, vector<1x8x128xf32>
    %11 = vector.shape_cast %10 : vector<1x8x128xf32> to vector<8x128xf32>
    %12 = arith.truncf %11 : vector<8x128xf32> to vector<8x128xbf16>
    %13 = vector.extract_strided_slice %6 {offsets = [0, 0], sizes = [1, 128], strides = [1, 1]} : vector<8x128xf32> to vector<1x128xf32>
    %14 = vector.extract_strided_slice %6 {offsets = [1, 0], sizes = [1, 128], strides = [1, 1]} : vector<8x128xf32> to vector<1x128xf32>
    %15 = vector.extract_strided_slice %6 {offsets = [2, 0], sizes = [1, 128], strides = [1, 1]} : vector<8x128xf32> to vector<1x128xf32>
    %cst = arith.constant dense<0.000000e+00> : vector<256x128xf32>
    %16 = tpu.matmul %0, %9, %cst {dimension_numbers = #tpu.dot_dimension_numbers<[1], [0], [0], [1], [0, 0, 1, 1], [], []>} : vector<256x8xbf16>, vector<8x128xbf16>, vector<256x128xf32> -> vector<256x128xf32>
    %17 = vector.broadcast %13 : vector<1x128xf32> to vector<256x128xf32>
    %18 = arith.addf %16, %17 : vector<256x128xf32>
    %cst_14 = arith.constant 0.000000e+00 : f32
    %19 = vector.broadcast %cst_14 : f32 to vector<256x128xf32>
    %20 = arith.maximumf %18, %19 : vector<256x128xf32>
    %21 = arith.truncf %20 : vector<256x128xf32> to vector<256x128xbf16>
    %cst_15 = arith.constant dense<0.000000e+00> : vector<256x128xf32>
    %22 = tpu.matmul %21, %2, %cst_15 {dimension_numbers = #tpu.dot_dimension_numbers<[1], [0], [0], [1], [0, 0, 1, 1], [], []>} : vector<256x128xbf16>, vector<128x128xbf16>, vector<256x128xf32> -> vector<256x128xf32>
    %23 = vector.broadcast %14 : vector<1x128xf32> to vector<256x128xf32>
    %24 = arith.addf %22, %23 : vector<256x128xf32>
    %cst_16 = arith.constant 0.000000e+00 : f32
    %25 = vector.broadcast %cst_16 : f32 to vector<256x128xf32>
    %26 = arith.maximumf %24, %25 : vector<256x128xf32>
    %27 = arith.truncf %26 : vector<256x128xf32> to vector<256x128xbf16>
    %cst_17 = arith.constant dense<0.000000e+00> : vector<256x128xf32>
    %28 = tpu.matmul %27, %4, %cst_17 {dimension_numbers = #tpu.dot_dimension_numbers<[1], [0], [0], [1], [0, 0, 1, 1], [], []>} : vector<256x128xbf16>, vector<128x128xbf16>, vector<256x128xf32> -> vector<256x128xf32>
    %29 = vector.broadcast %15 : vector<1x128xf32> to vector<256x128xf32>
    %30 = arith.addf %28, %29 : vector<256x128xf32>
    %cst_18 = arith.constant 0.000000e+00 : f32
    %31 = vector.broadcast %cst_18 : f32 to vector<256x128xf32>
    %32 = arith.maximumf %30, %31 : vector<256x128xf32>
    %33 = tpu.iota {dimensions = array<i32: 1>} : vector<256x128xi32>
    %c64_i32 = arith.constant 64 : i32
    %34 = vector.broadcast %c64_i32 : i32 to vector<256x128xi32>
    %35 = arith.cmpi eq, %33, %34 : vector<256x128xi32>
    %cst_19 = arith.constant 1.000000e+00 : f32
    %36 = vector.broadcast %cst_19 : f32 to vector<256x128xf32>
    %37 = arith.select %35, %36, %32 : vector<256x128xi1>, vector<256x128xf32>
    %38 = arith.truncf %37 : vector<256x128xf32> to vector<256x128xbf16>
    %cst_20 = arith.constant dense<0.000000e+00> : vector<8x256xf32>
    %39 = tpu.matmul %12, %38, %cst_20 {dimension_numbers = #tpu.dot_dimension_numbers<[1], [1], [0], [0], [0, 0, 1, 0], [], []>} : vector<8x128xbf16>, vector<256x128xbf16>, vector<8x256xf32> -> vector<8x256xf32>
    %c0_21 = arith.constant 0 : index
    %c0_22 = arith.constant 0 : index
    %40 = vector.load %arg4[%c0_21, %c0_22] : memref<8x256xf32, #tpu.memory_space<vmem>>, vector<8x256xf32>
    tpu.vector_store %arg4[%c0_21, %c0_22], %39 {strides = array<i32>} : memref<8x256xf32, #tpu.memory_space<vmem>>, vector<8x256xf32>,
    return
  }
  func.func @transform_0(%arg0: i32) -> (i32, i32) {
    %c0_i32 = arith.constant 0 : i32
    %c0_i32_0 = arith.constant 0 : i32
    return %arg0, %c0_i32 : i32, i32
  }
  func.func @transform_1(%arg0: i32) -> (i32, i32, i32) {
    %c0_i32 = arith.constant 0 : i32
    %c0_i32_0 = arith.constant 0 : i32
    %c0_i32_1 = arith.constant 0 : i32
    %c0_i32_2 = arith.constant 0 : i32
    return %c0_i32, %c0_i32_0, %c0_i32_1 : i32, i32, i32
  }
  func.func @transform_2(%arg0: i32) -> (i32, i32, i32) {
    %c0_i32 = arith.constant 0 : i32
    %c0_i32_0 = arith.constant 0 : i32
    %c0_i32_1 = arith.constant 0 : i32
    %c0_i32_2 = arith.constant 0 : i32
    return %c0_i32, %c0_i32_0, %c0_i32_1 : i32, i32, i32
  }
  func.func @transform_3(%arg0: i32) -> (i32, i32) {
    %c0_i32 = arith.constant 0 : i32
    %c0_i32_0 = arith.constant 0 : i32
    return %c0_i32, %arg0 : i32, i32
  }
}

</mosaic_0001>

<bundles_post_ra>
// kernel: nn_cartpole_forward.1
= control target key start
LH: loop header
LB: loop body
LE: loop exit
PB: predicated region body
PF: predicated region fallthrough
CT: control target
= control target key end

     0   :  { %s1611_s12 = smov 0   ;;  %s1986_s0 = inlined_call_operand.vmem [shape: bf16[512,8], index: 0, kind: input, shape index: {}]   ;;  %s1987_s1 = inlined_call_operand.vmem [shape: bf16[2,128,128], index: 1, kind: input, shape index: {}]   ;;  %s1988_s2 = inlined_call_operand.vmem [shape: f32[3,8,128], index: 2, kind: input, shape index: {}]   ;;  %s1989_s3 = inlined_call_operand.vmem [shape: f32[8,512], index: 3, kind: output, shape index: {}]  }
   0x1 LB: > { %s1249_s13 = sadd.s32 4294967295, %s1589_s12   ;;  %p1253_p0 = scmp.ge.s32.totalorder %s1589_s12, 1  ;;  %s1589_s12 = sphi %s1611_s12, %s13_s12  }
   0x2   : > { %p138_p1 = scmp.lt.s32.totalorder %s1589_s12, 3 }
   0x4   : > { %p139_p2 = pnand %p1253_p0, %p138_p1 }
   0x5   : > { %v1274_v0 = vld [vmem:[%s1988_s2 + $0x8] sm:$0xff] (!%p139_p2)  ;;  %vm380_vm0 = vcmask (!%p139_p2), 1043456   ;;  %s1254_s16 = sshll.u32 (!%p139_p2), %s1249_s13, 5  ;;  %v1567_v2 = vld [vmem:[%s1987_s1] sm:$0xff] (!%p139_p2)   ;;  %vm331_vm1 = vcmask (!%p139_p2), 64512   ;;  %v1569_v13 = vld [vmem:[%s1987_s1 + $0x10] sm:$0xff] (!%p139_p2)   ;;  %v247_v33 = vlaneseq (!%p139_p2) }
   0x6   : > { %142 = sbr.rel (%p139_p2) target bundleno = 995 (0x3e3), region = 32  ;;  %v243_v1 = vpack.c.bf16 (!%p139_p2), %v1274_v0, %v1274_v0  ;;  %p163_p3 = scmp.lt.s32.totalorder (!%p139_p2), %s1254_s16, 63  ;;  %v1568_v10 = vld [vmem:[%s1987_s1 + $0x8] sm:$0xff] (!%p139_p2)   ;;  %v1570_v18 = vld [vmem:[%s1987_s1 + $0x18] sm:$0xff] (!%p139_p2)   ;;  %v1571_v19 = vld [vmem:[%s1987_s1 + $0x20] sm:$0xff] (!%p139_p2)  }
   0x7   : > { %v1572_v23 = vld [vmem:[%s1987_s1 + $0x28] sm:$0xff] (!%p139_p2)   ;;  %v1573_v25 = vld [vmem:[%s1987_s1 + $0x30] sm:$0xff] (!%p139_p2)   ;;  %v1574_v26 = vld [vmem:[%s1987_s1 + $0x38] sm:$0xff] (!%p139_p2)   ;;  %v1704_v34 = vshrl.u32 (!%p139_p2), %v247_v33, 7  ;;  %s1256_s5 = sshll.u32 (!%p139_p2), %s1249_s13, 1 }
   0x8   : > { %1541 = vmatprep.subr.msk.bf16.mxu0 (!%p139_p2), %vm380_vm0, %v243_v1  ;;  %v382_v3 = vsel (!%p139_p2), %vm380_vm0, %v243_v1, 0  ;;  %1542 = vmatprep.subr.msk.bf16.mxu1 (!%p139_p2), %vm380_vm0, %v243_v1  ;;  %v1575_v27 = vld [vmem:[%s1987_s1 + $0x40] sm:$0xff] (!%p139_p2)   ;;  %v1576_v28 = vld [vmem:[%s1987_s1 + $0x48] sm:$0xff] (!%p139_p2)   ;;  %v1577_v29 = vld [vmem:[%s1987_s1 + $0x50] sm:$0xff] (!%p139_p2)   ;;  %p169_p4 = scmp.lt.s32.totalorder (!%p139_p2), %s1256_s5, 3 }
   0x9   : > { %1410 = vmatpush3.bf16.msra.mxu0 (!%p139_p2), %v382_v3  ;;  %1540 = vmatpush3.bf16.msra.mxu1 (!%p139_p2), %v382_v3  ;;  %v1578_v30 = vld [vmem:[%s1987_s1 + $0x58] sm:$0xff] (!%p139_p2)   ;;  %v1579_v31 = vld [vmem:[%s1987_s1 + $0x60] sm:$0xff] (!%p139_p2)   ;;  %v1580_v32 = vld [vmem:[%s1987_s1 + $0x68] sm:$0xff] (!%p139_p2)   ;;  %v249_v35 = vsub.s32 (!%p139_p2), 0, %v1704_v34 }
   0xa   : > { %1443 = vmatprep.subr.bf16.mxu1 (!%p139_p2), %v1567_v2  ;;  %1491 = vmatprep.subr.bf16.mxu0 (!%p139_p2), %v1575_v27  ;;  %v1710_v36 = vld [vmem:[%s1988_s2] sm:$0xff] (!%p139_p2) }
   0xb   : > { %v1713_v37 = vrot.slane (!%p139_p2), %v1710_v36, %v249_v35 }
   0xd   : > { %s1991_s16 = smov (!%p163_p3, %s1254_s16), 63  ;;  %s1993_s5 = smov (!%p169_p4, %s1256_s5), 3 }
   0xe   : > { %s1255_s19 = sshll.u32 %s1991_s16, 2  ;;  %s1257_s6 = sshll.u32 %s1993_s5, 3 }
   0xf   : > { %s1630_s22 = scalar_lea.vmem %s1986_s0, %s1255_s19  ;;  %s172_s9 = scalar_lea.vmem %s1989_s3, %s1257_s6 }
  0x10   : > { %v1551_v4 = vld [vmem:[%s1630_s22] sm:$0xff]   ;;  %v1552_v5 = vld [vmem:[%s1630_s22 + $0x8] sm:$0xff]   ;;  %v1553_v6 = vld [vmem:[%s1630_s22 + $0x10] sm:$0xff]  }
  0x11   : > { %1411 = vmatprep.mubr.msk.bf16.mxu0 %vm331_vm1, %v1551_v4  ;;  %v1554_v7 = vld [vmem:[%s1630_s22 + $0x18] sm:$0xff]   ;;  %v1555_v8 = vld [vmem:[%s1630_s22 + $0x20] sm:$0xff]   ;;  %v1560_v11 = vld [vmem:[%s1630_s22 + $0x48] sm:$0xff]  }
  0x12   : > { %1412 = vmatmul.mubr.msk.bf16.vlgmr.msra.gmra.mrb[0].mxu0 %vm331_vm1, %v1552_v5  ;;  %v1559_v9 = vld [vmem:[%s1630_s22 + $0x40] sm:$0xff]   ;;  %v1561_v12 = vld [vmem:[%s1630_s22 + $0x50] sm:$0xff]   ;;  %v1556_v14 = vld [vmem:[%s1630_s22 + $0x28] sm:$0xff]  }
  0x13   : > { %1415 = vmatprep.mubr.msk.bf16.mxu0 %vm331_vm1, %v1553_v6  ;;  %1427 = vmatprep.mubr.msk.bf16.mxu1 %vm331_vm1, %v1559_v9  ;;  %v1557_v15 = vld [vmem:[%s1630_s22 + $0x30] sm:$0xff]   ;;  %v1562_v16 = vld [vmem:[%s1630_s22 + $0x58] sm:$0xff]   ;;  %v1563_v17 = vld [vmem:[%s1630_s22 + $0x60] sm:$0xff]  }
  0x14   : > { %1428 = vmatmul.mubr.msk.bf16.vlgmr.msra.gmra.mrb[0].mxu1 %vm331_vm1, %v1560_v11  ;;  %v1558_v20 = vld [vmem:[%s1630_s22 + $0x38] sm:$0xff]   ;;  %v1564_v21 = vld [vmem:[%s1630_s22 + $0x68] sm:$0xff]   ;;  %v1565_v22 = vld [vmem:[%s1630_s22 + $0x70] sm:$0xff]   ;;  %1492 = vmatpush3.bf16.msra.mxu0 %v1575_v27 }
  0x15   : > { %1431 = vmatprep.mubr.msk.bf16.mxu1 %vm331_vm1, %v1561_v12  ;;  %1444 = vmatpush3.bf16.msra.mxu1 %v1567_v2  ;;  %v1566_v24 = vld [vmem:[%s1630_s22 + $0x78] sm:$0xff]  }
  0x16   : > { %1445 = vmatprep.subr.bf16.mxu1 %v1568_v10  ;;  %1493 = vmatprep.subr.bf16.mxu0 %v1576_v28 }
  0x18   : > { %1494 = vmatpush3.bf16.msra.mxu0 %v1576_v28 }
  0x19   : > { %1446 = vmatpush3.bf16.msra.mxu1 %v1568_v10  ;;  %1495 = vmatprep.subr.bf16.mxu0 %v1577_v29 }
  0x1a   : > { %1416 = vmatmul.mubr.msk.bf16.gmra.mrb[4].mxu0 %vm331_vm1, %v1554_v7  ;;  %1447 = vmatprep.subr.bf16.mxu1 %v1569_v13 }
  0x1b   : > { %1419 = vmatprep.mubr.msk.bf16.mxu0 %vm331_vm1, %v1555_v8 }
  0x1c   : > { %1432 = vmatmul.mubr.msk.bf16.gmra.mrb[4].mxu1 %vm331_vm1, %v1562_v16  ;;  %1496 = vmatpush3.bf16.msra.mxu0 %v1577_v29 }
  0x1d   : > { %1435 = vmatprep.mubr.msk.bf16.mxu1 %vm331_vm1, %v1563_v17  ;;  %1448 = vmatpush3.bf16.msra.mxu1 %v1569_v13 }
  0x1e   : > { %1449 = vmatprep.subr.bf16.mxu1 %v1570_v18  ;;  %1497 = vmatprep.subr.bf16.mxu0 %v1578_v30 }
  0x20   : > { %1498 = vmatpush3.bf16.msra.mxu0 %v1578_v30 }
  0x21   : > { %1450 = vmatpush3.bf16.msra.mxu1 %v1570_v18  ;;  %1499 = vmatprep.subr.bf16.mxu0 %v1579_v31 }
  0x22   : > { %1420 = vmatmul.mubr.msk.bf16.gmra.mrb[8].mxu0 %vm331_vm1, %v1556_v14  ;;  %1451 = vmatprep.subr.bf16.mxu1 %v1571_v19 }
  0x23   : > { %1423 = vmatprep.mubr.msk.bf16.mxu0 %vm331_vm1, %v1557_v15 }
  0x24   : > { %1436 = vmatmul.mubr.msk.bf16.gmra.mrb[8].mxu1 %vm331_vm1, %v1564_v21  ;;  %1500 = vmatpush3.bf16.msra.mxu0 %v1579_v31 }
  0x25   : > { %1439 = vmatprep.mubr.msk.bf16.mxu1 %vm331_vm1, %v1565_v22  ;;  %1452 = vmatpush3.bf16.msra.mxu1 %v1571_v19 }
  0x26   : > { %1453 = vmatprep.subr.bf16.mxu1 %v1572_v23  ;;  %1501 = vmatprep.subr.bf16.mxu0 %v1580_v32 }
  0x28   : > { %1502 = vmatpush3.bf16.msra.mxu0 %v1580_v32 }
  0x29   : > { %1454 = vmatpush3.bf16.msra.mxu1 %v1572_v23 }
  0x2a   : > { %1424 = vmatmul.mubr.msk.bf16.gmra.mrb[12].mxu0 %vm331_vm1, %v1558_v20  ;;  %1455 = vmatprep.subr.bf16.mxu1 %v1573_v25 }
  0x2c   : > { %1440 = vmatmul.mubr.msk.bf16.gmra.mrb[12].mxu1 %vm331_vm1, %v1566_v24 }
  0x2d   : > { %1456 = vmatpush3.bf16.msra.mxu1 %v1573_v25 }
  0x2e   : > { %1457 = vmatprep.subr.bf16.mxu1 %v1574_v26 }
  0x31   : > { %1458 = vmatpush3.bf16.msra.mxu1 %v1574_v26 }
  0xe5   : > { %v1413_v38 = vpop.f32.mrb[0].mxu0 }
  0xe6   : > { %v427_v39 = vadd.f32 %v1413_v38, %v1713_v37  ;;  %v418_v40 = vpop.f32.mrb[1].mxu0 }
  0xe7   : > { %v419_v41 = vadd.f32 %v418_v40, %v1713_v37  ;;  %v1414_v42 = vpop.f32.mrb[2].mxu0  ;;  %v1429_v53 = vpop.f32.mrb[0].mxu1 }
  0xe8   : > { %v430_v43 = vadd.f32 %v1414_v42, %v1713_v37  ;;  %v421_v44 = vpop.f32.mrb[3].mxu0  ;;  %v547_v46 = vmax.f32 %v427_v39, 0.0  ;;  %v491_v56 = vadd.f32 %v1429_v53, %v1713_v37  ;;  %v482_v57 = vpop.f32.mrb[1].mxu1 }
  0xe9   : > { %v422_v45 = vadd.f32 %v421_v44, %v1713_v37  ;;  %v545_v48 = vmax.f32 %v419_v41, 0.0  ;;  %v483_v60 = vadd.f32 %v482_v57, %v1713_v37  ;;  %v1430_v61 = vpop.f32.mrb[2].mxu1 }
  0xea   : > { %v548_v47 = vmax.f32 %v430_v43, 0.0  ;;  %v563_v0 = vmax.f32 %v491_v56, 0.0  ;;  %v494_v1 = vadd.f32 %v1430_v61, %v1713_v37  ;;  %v485_v2 = vpop.f32.mrb[3].mxu1 }
  0xeb   : > { %v546_v49 = vmax.f32 %v422_v45, 0.0  ;;  %v561_v4 = vmax.f32 %v483_v60, 0.0  ;;  %v486_v5 = vadd.f32 %v485_v2, %v1713_v37 }
  0xec   : > { %v578_v50 = vpack.c.bf16 %v548_v47, %v547_v46  ;;  %v564_v8 = vmax.f32 %v494_v1, 0.0 }
  0xed   : > { %v577_v51 = vpack.c.bf16 %v546_v49, %v545_v48  ;;  %v1417_v52 = vpop.f32.mrb[4].mxu0  ;;  %v562_v11 = vmax.f32 %v486_v5, 0.0 }
  0xee   : > { %v443_v54 = vadd.f32 %v1417_v52, %v1713_v37  ;;  %v434_v55 = vpop.f32.mrb[5].mxu0  ;;  %v1727_v13 = vpack.c.bf16 %v564_v8, %v563_v0 }
  0xef   : > { %v435_v58 = vadd.f32 %v434_v55, %v1713_v37  ;;  %v1418_v59 = vpop.f32.mrb[6].mxu0  ;;  %1459 = vmatprep.mubr.bf16.mxu1 %v577_v51  ;;  %v1729_v16 = vpack.c.bf16 %v562_v11, %v561_v4  ;;  %v1433_v17 = vpop.f32.mrb[4].mxu1 }
  0xf0   : > { %v446_v62 = vadd.f32 %v1418_v59, %v1713_v37  ;;  %v437_v63 = vpop.f32.mrb[7].mxu0  ;;  %1460 = vmatmul.mubr.bf16.vlgmr.msra.gmra.mrb[16].mxu1 %v578_v50  ;;  %v551_v6 = vmax.f32 %v443_v54, 0.0  ;;  %v507_v20 = vadd.f32 %v1433_v17, %v1713_v37  ;;  %v498_v21 = vpop.f32.mrb[5].mxu1 }
  0xf1   : > { %v438_v3 = vadd.f32 %v437_v63, %v1713_v37  ;;  %v549_v9 = vmax.f32 %v435_v58, 0.0  ;;  %v499_v24 = vadd.f32 %v498_v21, %v1713_v37  ;;  %v1434_v25 = vpop.f32.mrb[6].mxu1 }
  0xf2   : > { %v552_v7 = vmax.f32 %v446_v62, 0.0  ;;  %v567_v28 = vmax.f32 %v507_v20, 0.0  ;;  %v510_v29 = vadd.f32 %v1434_v25, %v1713_v37  ;;  %v501_v30 = vpop.f32.mrb[7].mxu1 }
  0xf3   : > { %v550_v10 = vmax.f32 %v438_v3, 0.0  ;;  %v565_v32 = vmax.f32 %v499_v24, 0.0  ;;  %v502_v35 = vadd.f32 %v501_v30, %v1713_v37 }
  0xf4   : > { %v580_v12 = vpack.c.bf16 %v552_v7, %v551_v6  ;;  %v568_v40 = vmax.f32 %v510_v29, 0.0 }
  0xf5   : > { %v579_v14 = vpack.c.bf16 %v550_v10, %v549_v9  ;;  %v1421_v15 = vpop.f32.mrb[8].mxu0  ;;  %v566_v43 = vmax.f32 %v502_v35, 0.0 }
  0xf6   : > { %v459_v18 = vadd.f32 %v1421_v15, %v1713_v37  ;;  %v450_v19 = vpop.f32.mrb[9].mxu0  ;;  %v588_v45 = vpack.c.bf16 %v568_v40, %v567_v28  ;;  %v1581_v28 = vld [vmem:[%s1987_s1 + $0x70] sm:$0xff]  }
  0xf7   : > { %v451_v22 = vadd.f32 %v450_v19, %v1713_v37  ;;  %v1422_v23 = vpop.f32.mrb[10].mxu0  ;;  %1463 = vmatprep.mubr.bf16.mxu1 %v579_v14  ;;  %v587_v48 = vpack.c.bf16 %v566_v43, %v565_v32  ;;  %v1437_v49 = vpop.f32.mrb[8].mxu1  ;;  %1503 = vmatprep.subr.bf16.mxu0 %v1581_v28 }
  0xf8   : > { %v462_v26 = vadd.f32 %v1422_v23, %v1713_v37  ;;  %v453_v27 = vpop.f32.mrb[11].mxu0  ;;  %1464 = vmatmul.mubr.bf16.gmra.mrb[20].mxu1 %v580_v12  ;;  %v555_v38 = vmax.f32 %v459_v18, 0.0  ;;  %v523_v52 = vadd.f32 %v1437_v49, %v1713_v37  ;;  %v514_v53 = vpop.f32.mrb[9].mxu1  ;;  %1504 = vmatpush3.bf16.msra.mxu0 %v1581_v28 }
  0xf9   : > { %v454_v31 = vadd.f32 %v453_v27, %v1713_v37  ;;  %v553_v41 = vmax.f32 %v451_v22, 0.0  ;;  %v515_v56 = vadd.f32 %v514_v53, %v1713_v37  ;;  %v1438_v57 = vpop.f32.mrb[10].mxu1 }
  0xfa   : > { %v556_v39 = vmax.f32 %v462_v26, 0.0  ;;  %v571_v60 = vmax.f32 %v523_v52, 0.0  ;;  %v526_v61 = vadd.f32 %v1438_v57, %v1713_v37  ;;  %v517_v62 = vpop.f32.mrb[11].mxu1 }
  0xfb   : > { %v554_v42 = vmax.f32 %v454_v31, 0.0  ;;  %v569_v0 = vmax.f32 %v515_v56, 0.0  ;;  %v518_v1 = vadd.f32 %v517_v62, %v1713_v37 }
  0xfc   : > { %v582_v44 = vpack.c.bf16 %v556_v39, %v555_v38  ;;  %v572_v4 = vmax.f32 %v526_v61, 0.0 }
  0xfd   : > { %v581_v46 = vpack.c.bf16 %v554_v42, %v553_v41  ;;  %v1425_v47 = vpop.f32.mrb[12].mxu0  ;;  %v570_v7 = vmax.f32 %v518_v1, 0.0 }
  0xfe   : > { %v475_v50 = vadd.f32 %v1425_v47, %v1713_v37  ;;  %v466_v51 = vpop.f32.mrb[13].mxu0  ;;  %v590_v9 = vpack.c.bf16 %v572_v4, %v571_v60 }
  0xff   : > { %v467_v54 = vadd.f32 %v466_v51, %v1713_v37  ;;  %v1426_v55 = vpop.f32.mrb[14].mxu0  ;;  %1467 = vmatprep.mubr.bf16.mxu1 %v581_v46  ;;  %v589_v11 = vpack.c.bf16 %v570_v7, %v569_v0  ;;  %v1441_v12 = vpop.f32.mrb[12].mxu1 }
 0x100   : > { %v478_v58 = vadd.f32 %v1426_v55, %v1713_v37  ;;  %v469_v59 = vpop.f32.mrb[15].mxu0  ;;  %1468 = vmatmul.mubr.bf16.gmra.mrb[24].mxu1 %v582_v44  ;;  %v559_v2 = vmax.f32 %v475_v50, 0.0  ;;  %v539_v14 = vadd.f32 %v1441_v12, %v1713_v37  ;;  %v530_v15 = vpop.f32.mrb[13].mxu1 }
 0x101   : > { %v470_v63 = vadd.f32 %v469_v59, %v1713_v37  ;;  %v557_v5 = vmax.f32 %v467_v54, 0.0  ;;  %v531_v17 = vadd.f32 %v530_v15, %v1713_v37  ;;  %v1442_v18 = vpop.f32.mrb[14].mxu1 }
 0x102   : > { %v560_v3 = vmax.f32 %v478_v58, 0.0  ;;  %v575_v19 = vmax.f32 %v539_v14, 0.0  ;;  %v542_v20 = vadd.f32 %v1442_v18, %v1713_v37  ;;  %v533_v21 = vpop.f32.mrb[15].mxu1 }
 0x103   : > { %v558_v6 = vmax.f32 %v470_v63, 0.0  ;;  %v573_v22 = vmax.f32 %v531_v17, 0.0  ;;  %v534_v23 = vadd.f32 %v533_v21, %v1713_v37  ;;  %v1582_v37 = vld [vmem:[%s1987_s1 + $0x78] sm:$0xff]  }
 0x104   : > { %v584_v8 = vpack.c.bf16 %v560_v3, %v559_v2  ;;  %v576_v24 = vmax.f32 %v542_v20, 0.0  ;;  %1505 = vmatprep.subr.bf16.mxu0 %v1582_v37 }
 0x105   : > { %v583_v10 = vpack.c.bf16 %v558_v6, %v557_v5  ;;  %v574_v25 = vmax.f32 %v534_v23, 0.0  ;;  %1506 = vmatpush3.bf16.msra.mxu0 %v1582_v37 }
 0x106   : > { %v592_v26 = vpack.c.bf16 %v576_v24, %v575_v19 }
 0x107   : > { %1471 = vmatprep.mubr.bf16.mxu1 %v583_v10  ;;  %v591_v27 = vpack.c.bf16 %v574_v25, %v573_v22 }
 0x108   : > { %1472 = vmatmul.mubr.bf16.gmra.mrb[28].mxu1 %v584_v8 }
 0x109   : > { %1475 = vmatprep.mubr.bf16.mxu1 %v1729_v16 }
 0x110   : > { %1476 = vmatmul.mubr.bf16.gmra.mrb[32].mxu1 %v1727_v13  ;;  %v595_v13 = vsub.s32 1, %v1704_v34 }
 0x111   : > { %1479 = vmatprep.mubr.bf16.mxu1 %v587_v48 }
 0x112   : > { %v1761_v16 = vrot.slane %v1710_v36, %v595_v13 }
 0x118   : > { %1480 = vmatmul.mubr.bf16.gmra.mrb[36].mxu1 %v588_v45 }
 0x119   : > { %1483 = vmatprep.mubr.bf16.mxu1 %v589_v11 }
 0x120   : > { %1484 = vmatmul.mubr.bf16.gmra.mrb[40].mxu1 %v590_v9 }
 0x121   : > { %1487 = vmatprep.mubr.bf16.mxu1 %v591_v27 }
 0x128   : > { %1488 = vmatmul.mubr.bf16.gmra.mrb[44].mxu1 %v592_v26 }
 0x1c3   : > { %v1461_v29 = vpop.f32.mrb[16].mxu1 }
 0x1c4   : > { %v688_v30 = vadd.f32 %v1461_v29, %v1761_v16  ;;  %v679_v31 = vpop.f32.mrb[17].mxu1 }
 0x1c5   : > { %v680_v32 = vadd.f32 %v679_v31, %v1761_v16  ;;  %v1462_v35 = vpop.f32.mrb[18].mxu1 }
 0x1c6   : > { %v691_v38 = vadd.f32 %v1462_v35, %v1761_v16  ;;  %v682_v39 = vpop.f32.mrb[19].mxu1  ;;  %v808_v41 = vmax.f32 %v688_v30, 0.0 }
 0x1c7   : > { %v683_v40 = vadd.f32 %v682_v39, %v1761_v16  ;;  %v806_v43 = vmax.f32 %v680_v32, 0.0 }
 0x1c8   : > { %v809_v42 = vmax.f32 %v691_v38, 0.0 }
 0x1c9   : > { %v807_v44 = vmax.f32 %v683_v40, 0.0 }
 0x1ca   : > { %v839_v45 = vpack.c.bf16 %v809_v42, %v808_v41 }
 0x1cb   : > { %v838_v46 = vpack.c.bf16 %v807_v44, %v806_v43  ;;  %v1465_v47 = vpop.f32.mrb[20].mxu1 }
 0x1cc   : > { %v704_v48 = vadd.f32 %v1465_v47, %v1761_v16  ;;  %v695_v49 = vpop.f32.mrb[21].mxu1 }
 0x1cd   : > { %v696_v50 = vadd.f32 %v695_v49, %v1761_v16  ;;  %v1466_v51 = vpop.f32.mrb[22].mxu1  ;;  %1507 = vmatprep.mubr.bf16.mxu0 %v838_v46 }
 0x1ce   : > { %v707_v52 = vadd.f32 %v1466_v51, %v1761_v16  ;;  %v698_v53 = vpop.f32.mrb[23].mxu1  ;;  %1508 = vmatmul.mubr.bf16.vlgmr.msra.gmra.mrb[16].mxu0 %v839_v45  ;;  %v812_v55 = vmax.f32 %v704_v48, 0.0 }
 0x1cf   : > { %v699_v54 = vadd.f32 %v698_v53, %v1761_v16  ;;  %v810_v57 = vmax.f32 %v696_v50, 0.0 }
 0x1d0   : > { %v813_v56 = vmax.f32 %v707_v52, 0.0 }
 0x1d1   : > { %v811_v58 = vmax.f32 %v699_v54, 0.0 }
 0x1d2   : > { %v841_v59 = vpack.c.bf16 %v813_v56, %v812_v55 }
 0x1d3   : > { %v840_v60 = vpack.c.bf16 %v811_v58, %v810_v57  ;;  %v1469_v61 = vpop.f32.mrb[24].mxu1 }
 0x1d4   : > { %v720_v62 = vadd.f32 %v1469_v61, %v1761_v16  ;;  %v711_v63 = vpop.f32.mrb[25].mxu1 }
 0x1d5   : > { %v712_v0 = vadd.f32 %v711_v63, %v1761_v16  ;;  %v1470_v1 = vpop.f32.mrb[26].mxu1  ;;  %1511 = vmatprep.mubr.bf16.mxu0 %v840_v60 }
 0x1d6   : > { %v723_v2 = vadd.f32 %v1470_v1, %v1761_v16  ;;  %v714_v3 = vpop.f32.mrb[27].mxu1  ;;  %1512 = vmatmul.mubr.bf16.gmra.mrb[20].mxu0 %v841_v59  ;;  %v816_v5 = vmax.f32 %v720_v62, 0.0 }
 0x1d7   : > { %v715_v4 = vadd.f32 %v714_v3, %v1761_v16  ;;  %v814_v7 = vmax.f32 %v712_v0, 0.0 }
 0x1d8   : > { %v817_v6 = vmax.f32 %v723_v2, 0.0 }
 0x1d9   : > { %v815_v8 = vmax.f32 %v715_v4, 0.0 }
 0x1da   : > { %v843_v9 = vpack.c.bf16 %v817_v6, %v816_v5 }
 0x1db   : > { %v842_v10 = vpack.c.bf16 %v815_v8, %v814_v7  ;;  %v1473_v11 = vpop.f32.mrb[28].mxu1 }
 0x1dc   : > { %v736_v12 = vadd.f32 %v1473_v11, %v1761_v16  ;;  %v727_v14 = vpop.f32.mrb[29].mxu1 }
 0x1dd   : > { %v728_v15 = vadd.f32 %v727_v14, %v1761_v16  ;;  %v1474_v17 = vpop.f32.mrb[30].mxu1  ;;  %1515 = vmatprep.mubr.bf16.mxu0 %v842_v10 }
 0x1de   : > { %v739_v18 = vadd.f32 %v1474_v17, %v1761_v16  ;;  %v730_v19 = vpop.f32.mrb[31].mxu1  ;;  %1516 = vmatmul.mubr.bf16.gmra.mrb[24].mxu0 %v843_v9  ;;  %v820_v21 = vmax.f32 %v736_v12, 0.0 }
 0x1df   : > { %v731_v20 = vadd.f32 %v730_v19, %v1761_v16  ;;  %v818_v23 = vmax.f32 %v728_v15, 0.0 }
 0x1e0   : > { %v821_v22 = vmax.f32 %v739_v18, 0.0 }
 0x1e1   : > { %v819_v24 = vmax.f32 %v731_v20, 0.0 }
 0x1e2   : > { %v845_v25 = vpack.c.bf16 %v821_v22, %v820_v21 }
 0x1e3   : > { %v844_v26 = vpack.c.bf16 %v819_v24, %v818_v23  ;;  %v1477_v27 = vpop.f32.mrb[32].mxu1  ;;  %v1275_v23 = vld [vmem:[%s1988_s2 + $0x10] sm:$0xff] }
 0x1e4   : > { %v752_v28 = vadd.f32 %v1477_v27, %v1761_v16  ;;  %v743_v37 = vpop.f32.mrb[33].mxu1  ;;  %v1798_v24 = vpack.c.bf16 %v1275_v23, %v1275_v23  ;;  %v1806_v27 = vand.u32 127, %v247_v33 }
 0x1e5   : > { %v744_v13 = vadd.f32 %v743_v37, %v1761_v16  ;;  %v1478_v29 = vpop.f32.mrb[34].mxu1  ;;  %1519 = vmatprep.mubr.bf16.mxu0 %v844_v26 }
 0x1e6   : > { %v755_v30 = vadd.f32 %v1478_v29, %v1761_v16  ;;  %v746_v31 = vpop.f32.mrb[35].mxu1  ;;  %1520 = vmatmul.mubr.bf16.gmra.mrb[28].mxu0 %v845_v25  ;;  %v824_v35 = vmax.f32 %v752_v28, 0.0  ;;  %1407 = vmatprep.mubr.bf16.mxu1 %v1798_v24  ;;  %v856_v25 = vsub.s32 2, %v1704_v34  ;;  %vm1101_vm2 = vcmp.eq.s32.totalorder %v1806_v27, 64 }
 0x1e7   : > { %v747_v32 = vadd.f32 %v746_v31, %v1761_v16  ;;  %v822_v39 = vmax.f32 %v744_v13, 0.0 }
 0x1e8   : > { %v825_v38 = vmax.f32 %v755_v30, 0.0  ;;  %v1803_v26 = vrot.slane %v1710_v36, %v856_v25 }
 0x1e9   : > { %v823_v40 = vmax.f32 %v747_v32, 0.0 }
 0x1ea   : > { %v847_v41 = vpack.c.bf16 %v825_v38, %v824_v35 }
 0x1eb   : > { %v846_v42 = vpack.c.bf16 %v823_v40, %v822_v39  ;;  %v1481_v43 = vpop.f32.mrb[36].mxu1 }
 0x1ec   : > { %v768_v44 = vadd.f32 %v1481_v43, %v1761_v16  ;;  %v759_v45 = vpop.f32.mrb[37].mxu1 }
 0x1ed   : > { %v760_v46 = vadd.f32 %v759_v45, %v1761_v16  ;;  %v1482_v47 = vpop.f32.mrb[38].mxu1  ;;  %1523 = vmatprep.mubr.bf16.mxu0 %v846_v42 }
 0x1ee   : > { %v828_v48 = vmax.f32 %v768_v44, 0.0  ;;  %v771_v49 = vadd.f32 %v1482_v47, %v1761_v16  ;;  %v762_v50 = vpop.f32.mrb[39].mxu1  ;;  %1524 = vmatmul.mubr.bf16.gmra.mrb[32].mxu0 %v847_v41 }
 0x1ef   : > { %v826_v51 = vmax.f32 %v760_v46, 0.0  ;;  %v763_v52 = vadd.f32 %v762_v50, %v1761_v16 }
 0x1f0   : > { %v829_v53 = vmax.f32 %v771_v49, 0.0 }
 0x1f1   : > { %v827_v54 = vmax.f32 %v763_v52, 0.0 }
 0x1f2   : > { %v849_v55 = vpack.c.bf16 %v829_v53, %v828_v48 }
 0x1f3   : > { %v848_v56 = vpack.c.bf16 %v827_v54, %v826_v51  ;;  %v1485_v57 = vpop.f32.mrb[40].mxu1 }
 0x1f4   : > { %v784_v58 = vadd.f32 %v1485_v57, %v1761_v16  ;;  %v775_v59 = vpop.f32.mrb[41].mxu1 }
 0x1f5   : > { %1527 = vmatprep.mubr.bf16.mxu0 %v848_v56  ;;  %v776_v60 = vadd.f32 %v775_v59, %v1761_v16  ;;  %v1486_v61 = vpop.f32.mrb[42].mxu1 }
 0x1f6   : > { %1528 = vmatmul.mubr.bf16.gmra.mrb[36].mxu0 %v849_v55  ;;  %v832_v62 = vmax.f32 %v784_v58, 0.0  ;;  %v787_v63 = vadd.f32 %v1486_v61, %v1761_v16  ;;  %v778_v0 = vpop.f32.mrb[43].mxu1 }
 0x1f7   : > { %v830_v1 = vmax.f32 %v776_v60, 0.0  ;;  %v779_v2 = vadd.f32 %v778_v0, %v1761_v16 }
 0x1f8   : > { %v833_v3 = vmax.f32 %v787_v63, 0.0 }
 0x1f9   : > { %v831_v4 = vmax.f32 %v779_v2, 0.0 }
 0x1fa   : > { %v851_v5 = vpack.c.bf16 %v833_v3, %v832_v62 }
 0x1fb   : > { %v850_v6 = vpack.c.bf16 %v831_v4, %v830_v1  ;;  %v1489_v7 = vpop.f32.mrb[44].mxu1 }
 0x1fc   : > { %v800_v8 = vadd.f32 %v1489_v7, %v1761_v16  ;;  %v791_v9 = vpop.f32.mrb[45].mxu1 }
 0x1fd   : > { %1531 = vmatprep.mubr.bf16.mxu0 %v850_v6  ;;  %v792_v10 = vadd.f32 %v791_v9, %v1761_v16  ;;  %v1490_v11 = vpop.f32.mrb[46].mxu1 }
 0x1fe   : > { %1532 = vmatmul.mubr.bf16.gmra.mrb[40].mxu0 %v851_v5  ;;  %v836_v12 = vmax.f32 %v800_v8, 0.0  ;;  %v803_v14 = vadd.f32 %v1490_v11, %v1761_v16  ;;  %v794_v15 = vpop.f32.mrb[47].mxu1 }
 0x1ff   : > { %v834_v17 = vmax.f32 %v792_v10, 0.0  ;;  %v795_v18 = vadd.f32 %v794_v15, %v1761_v16 }
 0x200   : > { %v837_v19 = vmax.f32 %v803_v14, 0.0 }
 0x201   : > { %v835_v20 = vmax.f32 %v795_v18, 0.0 }
 0x202   : > { %v853_v21 = vpack.c.bf16 %v837_v19, %v836_v12 }
 0x203   : > { %v852_v22 = vpack.c.bf16 %v835_v20, %v834_v17 }
 0x205   : > { %1535 = vmatprep.mubr.bf16.mxu0 %v852_v22 }
 0x206   : > { %1536 = vmatmul.mubr.bf16.gmra.mrb[44].mxu0 %v853_v21 }
 0x2a1   : > { %v1509_v16 = vpop.f32.mrb[16].mxu0 }
 0x2a2   : > { %v949_v28 = vadd.f32 %v1509_v16, %v1803_v26  ;;  %v940_v37 = vpop.f32.mrb[17].mxu0 }
 0x2a3   : > { %v941_v13 = vadd.f32 %v940_v37, %v1803_v26  ;;  %v1510_v29 = vpop.f32.mrb[18].mxu0 }
 0x2a4   : > { %v1069_v30 = vmax.f32 %v949_v28, 0.0  ;;  %v952_v31 = vadd.f32 %v1510_v29, %v1803_v26  ;;  %v943_v32 = vpop.f32.mrb[19].mxu0 }
 0x2a5   : > { %v1067_v34 = vmax.f32 %v941_v13, 0.0  ;;  %v944_v36 = vadd.f32 %v943_v32, %v1803_v26 }
 0x2a6   : > { %v1070_v35 = vmax.f32 %v952_v31, 0.0  ;;  %v1815_v33 = vsel %vm1101_vm2, 1.0, %v1069_v30 }
 0x2a7   : > { %v1068_v38 = vmax.f32 %v944_v36, 0.0  ;;  %v1823_v40 = vsel %vm1101_vm2, 1.0, %v1067_v34 }
 0x2a8   : > { %v1819_v39 = vsel %vm1101_vm2, 1.0, %v1070_v35 }
 0x2a9   : > { %v1135_v41 = vpack.c.bf16 %v1819_v39, %v1815_v33  ;;  %v1829_v42 = vsel %vm1101_vm2, 1.0, %v1068_v38  ;;  %v1513_v43 = vpop.f32.mrb[20].mxu0 }
 0x2aa   : > { %v1134_v44 = vpack.c.bf16 %v1829_v42, %v1823_v40  ;;  %v965_v45 = vadd.f32 %v1513_v43, %v1803_v26  ;;  %v956_v46 = vpop.f32.mrb[21].mxu0 }
 0x2ab   : > { %v957_v47 = vadd.f32 %v956_v46, %v1803_v26  ;;  %v1514_v48 = vpop.f32.mrb[22].mxu0 }
 0x2ac   : > { %v1073_v49 = vmax.f32 %v965_v45, 0.0  ;;  %v968_v50 = vadd.f32 %v1514_v48, %v1803_v26  ;;  %v959_v51 = vpop.f32.mrb[23].mxu0 }
 0x2ad   : > { %v1071_v52 = vmax.f32 %v957_v47, 0.0  ;;  %v960_v53 = vadd.f32 %v959_v51, %v1803_v26 }
 0x2ae   : > { %v1074_v54 = vmax.f32 %v968_v50, 0.0  ;;  %v1839_v56 = vsel %vm1101_vm2, 1.0, %v1073_v49 }
 0x2af   : > { %v1072_v55 = vmax.f32 %v960_v53, 0.0  ;;  %v1847_v58 = vsel %vm1101_vm2, 1.0, %v1071_v52 }
 0x2b0   : > { %v1843_v57 = vsel %vm1101_vm2, 1.0, %v1074_v54 }
 0x2b1   : > { %v1137_v59 = vpack.c.bf16 %v1843_v57, %v1839_v56  ;;  %v1853_v60 = vsel %vm1101_vm2, 1.0, %v1072_v55  ;;  %v1517_v61 = vpop.f32.mrb[24].mxu0 }
 0x2b2   : > { %v1136_v62 = vpack.c.bf16 %v1853_v60, %v1847_v58  ;;  %v981_v63 = vadd.f32 %v1517_v61, %v1803_v26  ;;  %v972_v0 = vpop.f32.mrb[25].mxu0 }
 0x2b3   : > { %v973_v1 = vadd.f32 %v972_v0, %v1803_v26  ;;  %v1518_v2 = vpop.f32.mrb[26].mxu0 }
 0x2b4   : > { %v1077_v3 = vmax.f32 %v981_v63, 0.0  ;;  %v984_v4 = vadd.f32 %v1518_v2, %v1803_v26  ;;  %v975_v5 = vpop.f32.mrb[27].mxu0 }
 0x2b5   : > { %v1075_v6 = vmax.f32 %v973_v1, 0.0  ;;  %v976_v7 = vadd.f32 %v975_v5, %v1803_v26 }
 0x2b6   : > { %v1078_v8 = vmax.f32 %v984_v4, 0.0  ;;  %v1863_v10 = vsel %vm1101_vm2, 1.0, %v1077_v3 }
 0x2b7   : > { %v1076_v9 = vmax.f32 %v976_v7, 0.0  ;;  %v1871_v12 = vsel %vm1101_vm2, 1.0, %v1075_v6 }
 0x2b8   : > { %v1867_v11 = vsel %vm1101_vm2, 1.0, %v1078_v8 }
 0x2b9   : > { %v1139_v14 = vpack.c.bf16 %v1867_v11, %v1863_v10  ;;  %v1877_v15 = vsel %vm1101_vm2, 1.0, %v1076_v9  ;;  %v1521_v17 = vpop.f32.mrb[28].mxu0 }
 0x2ba   : > { %v1138_v18 = vpack.c.bf16 %v1877_v15, %v1871_v12  ;;  %v997_v19 = vadd.f32 %v1521_v17, %v1803_v26  ;;  %v988_v20 = vpop.f32.mrb[29].mxu0 }
 0x2bb   : > { %v989_v21 = vadd.f32 %v988_v20, %v1803_v26  ;;  %v1522_v22 = vpop.f32.mrb[30].mxu0 }
 0x2bc   : > { %v1081_v23 = vmax.f32 %v997_v19, 0.0  ;;  %v1000_v25 = vadd.f32 %v1522_v22, %v1803_v26  ;;  %v991_v16 = vpop.f32.mrb[31].mxu0 }
 0x2bd   : > { %v1079_v28 = vmax.f32 %v989_v21, 0.0  ;;  %v992_v37 = vadd.f32 %v991_v16, %v1803_v26 }
 0x2be   : > { %v1082_v13 = vmax.f32 %v1000_v25, 0.0  ;;  %v1887_v30 = vsel %vm1101_vm2, 1.0, %v1081_v23 }
 0x2bf   : > { %v1080_v29 = vmax.f32 %v992_v37, 0.0  ;;  %v1895_v32 = vsel %vm1101_vm2, 1.0, %v1079_v28 }
 0x2c0   : > { %v1891_v31 = vsel %vm1101_vm2, 1.0, %v1082_v13 }
 0x2c1   : > { %v1141_v34 = vpack.c.bf16 %v1891_v31, %v1887_v30  ;;  %v1901_v36 = vsel %vm1101_vm2, 1.0, %v1080_v29  ;;  %v1525_v35 = vpop.f32.mrb[32].mxu0 }
 0x2c2   : > { %v1140_v38 = vpack.c.bf16 %v1901_v36, %v1895_v32  ;;  %v1013_v43 = vadd.f32 %v1525_v35, %v1803_v26  ;;  %v1004_v45 = vpop.f32.mrb[33].mxu0 }
 0x2c3   : > { %v1005_v46 = vadd.f32 %v1004_v45, %v1803_v26  ;;  %v1526_v47 = vpop.f32.mrb[34].mxu0 }
 0x2c4   : > { %v1085_v48 = vmax.f32 %v1013_v43, 0.0  ;;  %v1016_v49 = vadd.f32 %v1526_v47, %v1803_v26  ;;  %v1007_v50 = vpop.f32.mrb[35].mxu0 }
 0x2c5   : > { %v1083_v51 = vmax.f32 %v1005_v46, 0.0  ;;  %v1008_v52 = vadd.f32 %v1007_v50, %v1803_v26 }
 0x2c6   : > { %v1086_v53 = vmax.f32 %v1016_v49, 0.0  ;;  %v1120_v55 = vsel %vm1101_vm2, 1.0, %v1085_v48 }
 0x2c7   : > { %v1084_v54 = vmax.f32 %v1008_v52, 0.0  ;;  %v1118_v63 = vsel %vm1101_vm2, 1.0, %v1083_v51 }
 0x2c8   : > { %v1121_v61 = vsel %vm1101_vm2, 1.0, %v1086_v53 }
 0x2c9   : > { %v1119_v0 = vsel %vm1101_vm2, 1.0, %v1084_v54  ;;  %v1529_v1 = vpop.f32.mrb[36].mxu0  ;;  %v1143_v2 = vpack.c.bf16 %v1121_v61, %v1120_v55 }
 0x2ca   : > { %v1029_v3 = vadd.f32 %v1529_v1, %v1803_v26  ;;  %v1020_v4 = vpop.f32.mrb[37].mxu0  ;;  %v1142_v5 = vpack.c.bf16 %v1119_v0, %v1118_v63 }
 0x2cb   : > { %v1021_v6 = vadd.f32 %v1020_v4, %v1803_v26  ;;  %v1530_v7 = vpop.f32.mrb[38].mxu0 }
 0x2cc   : > { %v1089_v8 = vmax.f32 %v1029_v3, 0.0  ;;  %v1032_v9 = vadd.f32 %v1530_v7, %v1803_v26  ;;  %v1023_v17 = vpop.f32.mrb[39].mxu0  ;;  %1391 = vmatprep.subr.bf16.mxu1 %v1142_v5 }
 0x2cd   : > { %v1087_v19 = vmax.f32 %v1021_v6, 0.0  ;;  %v1024_v20 = vadd.f32 %v1023_v17, %v1803_v26  ;;  %1392 = vmatpush3.bf16.xpose.msra.mxu1 %v1134_v44 }
 0x2ce   : > { %v1090_v21 = vmax.f32 %v1032_v9, 0.0  ;;  %1393 = vmatprep.subr.bf16.mxu1 %v1143_v2  ;;  %v1124_v23 = vsel %vm1101_vm2, 1.0, %v1089_v8 }
 0x2cf   : > { %v1088_v22 = vmax.f32 %v1024_v20, 0.0  ;;  %v1122_v16 = vsel %vm1101_vm2, 1.0, %v1087_v19 }
 0x2d0   : > { %v1125_v25 = vsel %vm1101_vm2, 1.0, %v1090_v21 }
 0x2d1   : > { %v1123_v28 = vsel %vm1101_vm2, 1.0, %v1088_v22  ;;  %v1533_v37 = vpop.f32.mrb[40].mxu0  ;;  %v1145_v13 = vpack.c.bf16 %v1125_v25, %v1124_v23 }
 0x2d2   : > { %v1045_v40 = vadd.f32 %v1533_v37, %v1803_v26  ;;  %v1144_v42 = vpack.c.bf16 %v1123_v28, %v1122_v16  ;;  %v1036_v44 = vpop.f32.mrb[41].mxu0 }
 0x2d3   : > { %v1037_v29 = vadd.f32 %v1036_v44, %v1803_v26  ;;  %v1534_v35 = vpop.f32.mrb[42].mxu0 }
 0x2d4   : > { %v1093_v43 = vmax.f32 %v1045_v40, 0.0  ;;  %v1048_v45 = vadd.f32 %v1534_v35, %v1803_v26  ;;  %v1039_v46 = vpop.f32.mrb[43].mxu0 }
 0x2d5   : > { %1394 = vmatpush3.bf16.xpose.msra.mxu1 %v1135_v41  ;;  %v1091_v47 = vmax.f32 %v1037_v29, 0.0  ;;  %v1040_v48 = vadd.f32 %v1039_v46, %v1803_v26 }
 0x2d6   : > { %v1128_v49 = vsel %vm1101_vm2, 1.0, %v1093_v43  ;;  %1395 = vmatprep.subr.bf16.mxu1 %v1144_v42  ;;  %v1094_v50 = vmax.f32 %v1048_v45, 0.0 }
 0x2d7   : > { %v1126_v51 = vsel %vm1101_vm2, 1.0, %v1091_v47  ;;  %v1092_v52 = vmax.f32 %v1040_v48, 0.0 }
 0x2d8   : > { %v1129_v53 = vsel %vm1101_vm2, 1.0, %v1094_v50 }
 0x2d9   : > { %v1127_v54 = vsel %vm1101_vm2, 1.0, %v1092_v52  ;;  %v1537_v33 = vpop.f32.mrb[44].mxu0  ;;  %v1147_v39 = vpack.c.bf16 %v1129_v53, %v1128_v49 }
 0x2da   : > { %v1061_v41 = vadd.f32 %v1537_v33, %v1803_v26  ;;  %v1146_v55 = vpack.c.bf16 %v1127_v54, %v1126_v51  ;;  %v1052_v61 = vpop.f32.mrb[45].mxu0 }
 0x2db   : > { %v1053_v63 = vadd.f32 %v1052_v61, %v1803_v26  ;;  %v1538_v0 = vpop.f32.mrb[46].mxu0 }
 0x2dc   : > { %v1097_v1 = vmax.f32 %v1061_v41, 0.0  ;;  %v1064_v2 = vadd.f32 %v1538_v0, %v1803_v26  ;;  %v1055_v3 = vpop.f32.mrb[47].mxu0 }
 0x2dd   : > { %1396 = vmatpush3.bf16.xpose.msra.mxu1 %v1136_v62  ;;  %v1095_v4 = vmax.f32 %v1053_v63, 0.0  ;;  %v1056_v5 = vadd.f32 %v1055_v3, %v1803_v26 }
 0x2de   : > { %1397 = vmatprep.subr.bf16.mxu1 %v1145_v13  ;;  %v1132_v6 = vsel %vm1101_vm2, 1.0, %v1097_v1  ;;  %v1098_v7 = vmax.f32 %v1064_v2, 0.0 }
 0x2df   : > { %v1130_v8 = vsel %vm1101_vm2, 1.0, %v1095_v4  ;;  %v1096_v9 = vmax.f32 %v1056_v5, 0.0 }
 0x2e0   : > { %v1133_v17 = vsel %vm1101_vm2, 1.0, %v1098_v7 }
 0x2e1   : > { %v1131_v58 = vsel %vm1101_vm2, 1.0, %v1096_v9  ;;  %v1149_v60 = vpack.c.bf16 %v1133_v17, %v1132_v6 }
 0x2e2   : > { %v1148_v62 = vpack.c.bf16 %v1131_v58, %v1130_v8 }
 0x2e5   : > { %1398 = vmatpush3.bf16.xpose.msra.mxu1 %v1137_v59 }
 0x2e6   : > { %1399 = vmatprep.subr.bf16.mxu1 %v1146_v55 }
 0x2ed   : > { %1400 = vmatpush3.bf16.xpose.msra.mxu1 %v1138_v18 }
 0x2ee   : > { %1401 = vmatprep.subr.bf16.mxu1 %v1147_v39 }
 0x2f5   : > { %1402 = vmatpush3.bf16.xpose.msra.mxu1 %v1139_v14 }
 0x2f6   : > { %1403 = vmatprep.subr.bf16.mxu1 %v1148_v62 }
 0x2fd   : > { %1404 = vmatpush3.bf16.xpose.msra.mxu1 %v1140_v38 }
 0x2fe   : > { %1405 = vmatprep.subr.bf16.mxu1 %v1149_v60 }
 0x305   : > { %1406 = vmatpush3.bf16.xpose.msra.mxu1 %v1141_v34 }
 0x30c   : > { %1408 = vmatmul.mubr.bf16.vlgmr.msra.gmra.mrb[48].mxu1 %v1798_v24 }
 0x3df   : > { %v1184_v26 = vpop.f32.mrb[48].mxu1 }
 0x3e0   : > { %1191 = vst [vmem:[%s172_s9] sm:$0xff] %v1184_v26  ;;  %v1186_v27 = vpop.f32.mrb[49].mxu1 }
 0x3e1   : > { %1192 = vst [vmem:[%s172_s9 + $0x8] sm:$0xff] %v1186_v27  ;;  %v1188_v56 = vpop.f32.mrb[50].mxu1 }
 0x3e2   : > { %v1189_v57 = vpop.f32.mrb[51].mxu1 }
 0x3e3 PF: > { %s13_s12 = sadd.s32 1, %s1589_s12  }
 0x3e4   : > { %p10_p5 = scmp.ge.s32.totalorder %s13_s12, 4  }
 0x3e6   :  { %12 = sbr.rel (!%p10_p5) target bundleno = 1 (0x1), region = 65 }

</bundles_post_ra>
